<compile_context>
chip_gen: v5e
topology: v5e:2x2
jax: 0.10.0
libtpu: 0.0.40
codegen_flags: <defaults>
</compile_context>

<pallas_src>
import functools
import math

import jax
import jax.numpy as jnp
from jax import lax
from jax.experimental import pallas as pl
from jax.experimental.pallas import tpu as pltpu


_SUBLANE = {4: 8, 2: 16, 1: 32}          # sublane multiple per itemsize
_VMEM_LIMIT = 48 * 1024 * 1024           # requested scoped VMEM (safe on v5e/v6e/v7x)
_VMEM_TARGET = 40 * 1024 * 1024          # what we actually plan to use
_DEFAULT_EDGE_BLOCK = 12 * 1024 * 1024   # per-buffer streamed edge block budget


def _round_up(x, m):
    return ((x + m - 1) // m) * m


def _cdiv(a, b):
    return (a + b - 1) // b


def _accum_chunks(x_ref, acc_ref, n_chunks, cb):
    """acc_ref[tb, cb] += sum_{c < n_chunks} x_ref[:, c*cb:(c+1)*cb]  (f32)."""
    if n_chunks <= 0:
        return
    if n_chunks <= 8:
        # Static unroll: constant, lane-tile-aligned slices.
        for c in range(n_chunks):
            acc_ref[...] += x_ref[:, c * cb:(c + 1) * cb].astype(jnp.float32)
    else:
        def body(c, carry):
            off = pl.multiple_of(c * cb, 128)
            acc_ref[...] += x_ref[:, pl.ds(off, cb)].astype(jnp.float32)
            return carry
        lax.fori_loop(0, n_chunks, body, 0)


def _flat_readout_kernel(x_ref, w_ref, b_ref, o_ref, acc_ref, *,
                         cb, n_k, tk, flat_len, inv_e):
    # x_ref:   (tb, tk)        streamed lane-dense edge block (tk % cb == 0)
    # w_ref:   (cb, C_out_p)   replicated weights, resident
    # b_ref:   (1, C_out_p)    bias, resident
    # o_ref:   (tb, C_out_p)   output block (written at k == n_k-1)
    # acc_ref: (tb, cb)        f32 channel-bucket accumulator
    k = pl.program_id(1)

    @pl.when(k == 0)
    def _():
        acc_ref[...] = jnp.zeros_like(acc_ref)

    chunks_full = tk // cb
    rem = flat_len - (n_k - 1) * tk            # valid elems in the last block
    last_full = rem // cb
    tail = rem - last_full * cb

    if rem == tk:
        # Every block is fully valid -> no masking anywhere.
        _accum_chunks(x_ref, acc_ref, chunks_full, cb)
    else:
        @pl.when(k < n_k - 1)
        def _():
            _accum_chunks(x_ref, acc_ref, chunks_full, cb)

        @pl.when(k == n_k - 1)
        def _():
            _accum_chunks(x_ref, acc_ref, last_full, cb)
            if tail > 0:
                x = x_ref[:, last_full * cb:(last_full + 1) * cb]
                x = x.astype(jnp.float32)
                lane = lax.broadcasted_iota(jnp.int32, x.shape, 1)
                acc_ref[...] += jnp.where(lane < tail, x, 0.0)

    @pl.when(k == n_k - 1)
    def _():
        mean = acc_ref[...] * inv_e                               # (tb, cb) f32
        # Tiny epilogue matmul, f32 accumulate; W upcast once per batch tile so
        # bf16 weights do not degrade accuracy.
        res = jnp.dot(mean, w_ref[...].astype(jnp.float32),
                      preferred_element_type=jnp.float32)         # (tb, C_out_p)
        res = res + b_ref[...].astype(jnp.float32)
        # dropout: inference mode (training=False) -> identity.
        # TODO(synk): training-mode dropout would need pltpu.prng_seed/prng_random_bits.
        o_ref[...] = jnp.maximum(res, 0.0).astype(o_ref.dtype)    # act == ReLU


def _blocked_readout_kernel(x_ref, w_ref, b_ref, o_ref, acc_ref, *,
                            n_k, te, n_edges, inv_e):
    # Fallback for channel counts whose lcm with 128 is too large.
    # x_ref: (tb, te, C_in); acc_ref: (tb, C_in) f32.
    k = pl.program_id(1)

    @pl.when(k == 0)
    def _():
        acc_ref[...] = jnp.zeros_like(acc_ref)

    rem = n_edges - (n_k - 1) * te             # valid edge rows in last block

    if rem == te:
        acc_ref[...] += jnp.sum(x_ref[...], axis=1, dtype=jnp.float32)
    else:
        @pl.when(k < n_k - 1)
        def _():
            acc_ref[...] += jnp.sum(x_ref[...], axis=1, dtype=jnp.float32)

        @pl.when(k == n_k - 1)
        def _():
            x = x_ref[...].astype(jnp.float32)
            e_idx = lax.broadcasted_iota(jnp.int32, x.shape, 1)
            x = jnp.where(e_idx < rem, x, 0.0)
            acc_ref[...] += jnp.sum(x, axis=1)

    @pl.when(k == n_k - 1)
    def _():
        mean = acc_ref[...] * inv_e
        res = jnp.dot(mean, w_ref[...].astype(jnp.float32),
                      preferred_element_type=jnp.float32)
        res = res + b_ref[...].astype(jnp.float32)
        o_ref[...] = jnp.maximum(res, 0.0).astype(o_ref.dtype)


def pattern_readout(edge_attr, w, b, *, batch_tile=None, edge_block_bytes=None):
    """edge_attr: (B, E, C_in); w: (C_in, C_out); b: (1, C_out) -> (B, C_out)."""
    B, E, C_in = edge_attr.shape
    C_out = w.shape[1]
    out_dtype = edge_attr.dtype
    x_itemsize = jnp.dtype(edge_attr.dtype).itemsize
    w_itemsize = jnp.dtype(w.dtype).itemsize
    sub = _SUBLANE.get(x_itemsize, 8)

    # Lane-dense output: pad weights / bias (small arrays) to a 128 multiple.
    C_out_p = _round_up(C_out, 128)
    if C_out_p != C_out:
        w = jnp.pad(w, ((0, 0), (0, C_out_p - C_out)))
        b = jnp.pad(b, ((0, 0), (0, C_out_p - C_out)))

    # Batch tile: balanced split, rounded to the dtype sublane multiple, and
    # >= 2 tiles once B is big enough so v7x's two TensorCores both get work.
    if batch_tile is None:
        n_b = max(_cdiv(B, 256), 2 if B >= 2 * sub else 1)
        batch_tile = _cdiv(B, n_b)
    tb = _round_up(max(batch_tile, 1), sub)
    nb = _cdiv(B, tb)

    inv_e = 1.0 / float(E)

    # Channel bucket width: smallest lane-aligned width whose lane j maps to
    # channel j % C_in (so replicated weights undo the bucketing for free).
    cb = (C_in * 128) // math.gcd(C_in, 128)
    use_flat = cb <= 2048

    # Real padded-VMEM byte budget for the streamed edge block.
    if edge_block_bytes is None:
        edge_block_bytes = _DEFAULT_EDGE_BLOCK
    acc_cols = cb if use_flat else C_in
    w_rows = cb if use_flat else C_in
    fixed = (2 * _round_up(w_rows, 8) * C_out_p * w_itemsize        # weights
             + 2 * 8 * C_out_p * w_itemsize                         # bias
             + 2 * tb * C_out_p * x_itemsize                        # out block
             + tb * _round_up(acc_cols, 128) * 4)                   # f32 acc
    budget = max(1 << 20, min(edge_block_bytes, (_VMEM_TARGET - fixed) // 2))

    compiler_params = pltpu.CompilerParams(
        dimension_semantics=("parallel", "arbitrary"),
        vmem_limit_bytes=_VMEM_LIMIT)

    if use_flat:
        # ---- lane-dense flat streaming path -------------------------------
        flat_len = E * C_in
        tk_cap = max(cb, (budget // (tb * x_itemsize)) // cb * cb)
        n_k = max(1, _cdiv(flat_len, tk_cap))
        tk = _round_up(_cdiv(flat_len, n_k), cb)      # balanced, multiple of cb
        n_k = _cdiv(flat_len, tk)

        x2d = edge_attr.reshape(B, flat_len)          # free contiguous reshape
        w_rep = jnp.tile(w, (cb // C_in, 1))          # (cb, C_out_p), tiny

        kernel = functools.partial(
            _flat_readout_kernel, cb=cb, n_k=n_k, tk=tk,
            flat_len=flat_len, inv_e=inv_e)

        out = pl.pallas_call(
            kernel,
            out_shape=jax.ShapeDtypeStruct((B, C_out_p), out_dtype),
            grid_spec=pltpu.PrefetchScalarGridSpec(
                num_scalar_prefetch=0,
                grid=(nb, n_k),
                in_specs=[
                    pl.BlockSpec((tb, tk), lambda i, k: (i, k)),
                    pl.BlockSpec((cb, C_out_p), lambda i, k: (0, 0)),
                    pl.BlockSpec((1, C_out_p), lambda i, k: (0, 0)),
                ],
                out_specs=pl.BlockSpec((tb, C_out_p), lambda i, k: (i, 0)),
                scratch_shapes=[pltpu.VMEM((tb, cb), jnp.float32)],
            ),
            compiler_params=compiler_params,
        )(x2d, w_rep, b)
    else:
        # ---- fallback: 3-D blocks with lane-padded C_in -------------------
        row_bytes = tb * _round_up(C_in, 128) * x_itemsize   # real padded bytes
        te_cap = max(sub, (budget // row_bytes) // sub * sub)
        n_k = max(1, _cdiv(E, te_cap))
        te = _round_up(_cdiv(E, n_k), sub)
        n_k = _cdiv(E, te)

        kernel = functools.partial(
            _blocked_readout_kernel, n_k=n_k, te=te, n_edges=E, inv_e=inv_e)

        out = pl.pallas_call(
            kernel,
            out_shape=jax.ShapeDtypeStruct((B, C_out_p), out_dtype),
            grid_spec=pltpu.PrefetchScalarGridSpec(
                num_scalar_prefetch=0,
                grid=(nb, n_k),
                in_specs=[
                    pl.BlockSpec((tb, te, C_in), lambda i, k: (i, k, 0)),
                    pl.BlockSpec((C_in, C_out_p), lambda i, k: (0, 0)),
                    pl.BlockSpec((1, C_out_p), lambda i, k: (0, 0)),
                ],
                out_specs=pl.BlockSpec((tb, C_out_p), lambda i, k: (i, 0)),
                scratch_shapes=[pltpu.VMEM((tb, C_in), jnp.float32)],
            ),
            compiler_params=compiler_params,
        )(edge_attr, w, b)

    return out if C_out_p == C_out else out[:, :C_out]


def init_params(key, input_channels, output_channels):
    # xavier_uniform_ for W_readout_p, zeros for bais_readout_p (reset_parameters)
    limit = math.sqrt(6.0 / (input_channels + output_channels))
    w = jax.random.uniform(key, (input_channels, output_channels),
                           minval=-limit, maxval=limit, dtype=jnp.float32)
    b = jnp.zeros((1, output_channels), dtype=jnp.float32)
    return w, b


def _reference(edge_attr, w, b):
    return jnp.maximum(jnp.mean(edge_attr, axis=1) @ w + b, 0.0)


def _check(edge_attr, w, b):
    out = jax.block_until_ready(pattern_readout(edge_attr, w, b))
    ref = _reference(edge_attr, w, b)
    assert out.shape == ref.shape
    assert jnp.allclose(out, ref, atol=1e-4, rtol=1e-4), (
        float(jnp.max(jnp.abs(out - ref))))
    return out


if __name__ == "__main__":
    key = jax.random.PRNGKey(0)
    ks = jax.random.split(key, 8)

    # 1) Aligned shapes: flat lane-dense path, static-unrolled chunk loop.
    B, E, C_in, C_out = 8, 16, 32, 64
    w, bias = init_params(ks[0], C_in, C_out)
    edge_attr = jax.random.normal(ks[1], (B, E, C_in), dtype=jnp.float32)
    _check(edge_attr, w, bias)

    # 2) Unaligned B / E / C_out: OOB batch rows + masked tail chunk + lane pad.
    B2, E2, C_in2, C_out2 = 5, 13, 32, 48
    w2, bias2 = init_params(ks[2], C_in2, C_out2)
    edge_attr2 = jax.random.normal(ks[3], (B2, E2, C_in2), dtype=jnp.float32)
    _check(edge_attr2, w2, bias2)

    # 3) Larger shapes: two batch tiles (v7x dual-core split) + fori chunk loop.
    B3, E3, C_in3, C_out3 = 24, 600, 32, 64
    w3, bias3 = init_params(ks[4], C_in3, C_out3)
    edge_attr3 = jax.random.normal(ks[5], (B3, E3, C_in3), dtype=jnp.float32)
    _check(edge_attr3, w3, bias3)

    # 4) Awkward channel count (lcm(C_in,128) too large): 3-D fallback path.
    B4, E4, C_in4, C_out4 = 3, 7, 33, 10
    w4, bias4 = init_params(ks[6], C_in4, C_out4)
    edge_attr4 = jax.random.normal(ks[7], (B4, E4, C_in4), dtype=jnp.float32)
    _check(edge_attr4, w4, bias4)

    print("KERNEL_OK")
</pallas_src>

<mosaic_0001>
module attributes {stable_mosaic.version = 11 : i64} {
  func.func @_flat_readout_kernel(%arg0: i32, %arg1: i32, %arg2: memref<8x512xf32, #tpu.memory_space<vmem>>, %arg3: memref<128x128xf32, #tpu.memory_space<vmem>>, %arg4: memref<1x128xf32, #tpu.memory_space<vmem>>, %arg5: memref<8x128xf32, #tpu.memory_space<vmem>>, %arg6: memref<8x128xf32, #tpu.memory_space<vmem>>) attributes {dimension_semantics = [#tpu.dimension_semantics<parallel>, #tpu.dimension_semantics<arbitrary>], iteration_bounds = array<i64: 1, 1>, scalar_prefetch = 0 : i64, scratch_operands = 1 : i64, tpu.core_type = #tpu.core_type<tc>, window_params = [{transform_indices = @transform_0, window_bounds = array<i64: 8, 512>}, {pipeline_mode = #tpu.pipeline_mode<synchronous>, transform_indices = @transform_1, window_bounds = array<i64: 128, 128>}, {pipeline_mode = #tpu.pipeline_mode<synchronous>, transform_indices = @transform_2, window_bounds = array<i64: 1, 128>}, {transform_indices = @transform_3, window_bounds = array<i64: 8, 128>}]} {
    %c0_i32 = arith.constant 0 : i32
    %0 = arith.cmpi eq, %arg1, %c0_i32 : i32
    %1 = arith.extui %0 : i1 to i32
    %c0_i32_0 = arith.constant 0 : i32
    %2 = arith.cmpi ne, %1, %c0_i32_0 : i32
    scf.if %2 {
      %cst = arith.constant 0.000000e+00 : f32
      %22 = vector.broadcast %cst : f32 to vector<8x128xf32>
      %c0_23 = arith.constant 0 : index
      %c0_24 = arith.constant 0 : index
      %23 = vector.load %arg6[%c0_23, %c0_24] : memref<8x128xf32, #tpu.memory_space<vmem>>, vector<8x128xf32>
      tpu.vector_store %arg6[%c0_23, %c0_24], %22 {strides = array<i32>} : memref<8x128xf32, #tpu.memory_space<vmem>>, vector<8x128xf32>,
    } else {
    }
    %c0 = arith.constant 0 : index
    %c0_1 = arith.constant 0 : index
    %3 = vector.load %arg6[%c0, %c0_1] : memref<8x128xf32, #tpu.memory_space<vmem>>, vector<8x128xf32>
    %c0_2 = arith.constant 0 : index
    %c0_3 = arith.constant 0 : index
    %4 = vector.load %arg2[%c0_2, %c0_3] : memref<8x512xf32, #tpu.memory_space<vmem>>, vector<8x128xf32>
    %5 = arith.addf %3, %4 : vector<8x128xf32>
    %c0_4 = arith.constant 0 : index
    %c0_5 = arith.constant 0 : index
    %6 = vector.load %arg6[%c0_4, %c0_5] : memref<8x128xf32, #tpu.memory_space<vmem>>, vector<8x128xf32>
    tpu.vector_store %arg6[%c0_4, %c0_5], %5 {strides = array<i32>} : memref<8x128xf32, #tpu.memory_space<vmem>>, vector<8x128xf32>,
    %c0_6 = arith.constant 0 : index
    %c0_7 = arith.constant 0 : index
    %7 = vector.load %arg6[%c0_6, %c0_7] : memref<8x128xf32, #tpu.memory_space<vmem>>, vector<8x128xf32>
    %c0_8 = arith.constant 0 : index
    %c128 = arith.constant 128 : index
    %8 = vector.load %arg2[%c0_8, %c128] : memref<8x512xf32, #tpu.memory_space<vmem>>, vector<8x128xf32>
    %9 = arith.addf %7, %8 : vector<8x128xf32>
    %c0_9 = arith.constant 0 : index
    %c0_10 = arith.constant 0 : index
    %10 = vector.load %arg6[%c0_9, %c0_10] : memref<8x128xf32, #tpu.memory_space<vmem>>, vector<8x128xf32>
    tpu.vector_store %arg6[%c0_9, %c0_10], %9 {strides = array<i32>} : memref<8x128xf32, #tpu.memory_space<vmem>>, vector<8x128xf32>,
    %c0_11 = arith.constant 0 : index
    %c0_12 = arith.constant 0 : index
    %11 = vector.load %arg6[%c0_11, %c0_12] : memref<8x128xf32, #tpu.memory_space<vmem>>, vector<8x128xf32>
    %c0_13 = arith.constant 0 : index
    %c256 = arith.constant 256 : index
    %12 = vector.load %arg2[%c0_13, %c256] : memref<8x512xf32, #tpu.memory_space<vmem>>, vector<8x128xf32>
    %13 = arith.addf %11, %12 : vector<8x128xf32>
    %c0_14 = arith.constant 0 : index
    %c0_15 = arith.constant 0 : index
    %14 = vector.load %arg6[%c0_14, %c0_15] : memref<8x128xf32, #tpu.memory_space<vmem>>, vector<8x128xf32>
    tpu.vector_store %arg6[%c0_14, %c0_15], %13 {strides = array<i32>} : memref<8x128xf32, #tpu.memory_space<vmem>>, vector<8x128xf32>,
    %c0_16 = arith.constant 0 : index
    %c0_17 = arith.constant 0 : index
    %15 = vector.load %arg6[%c0_16, %c0_17] : memref<8x128xf32, #tpu.memory_space<vmem>>, vector<8x128xf32>
    %c0_18 = arith.constant 0 : index
    %c384 = arith.constant 384 : index
    %16 = vector.load %arg2[%c0_18, %c384] : memref<8x512xf32, #tpu.memory_space<vmem>>, vector<8x128xf32>
    %17 = arith.addf %15, %16 : vector<8x128xf32>
    %c0_19 = arith.constant 0 : index
    %c0_20 = arith.constant 0 : index
    %18 = vector.load %arg6[%c0_19, %c0_20] : memref<8x128xf32, #tpu.memory_space<vmem>>, vector<8x128xf32>
    tpu.vector_store %arg6[%c0_19, %c0_20], %17 {strides = array<i32>} : memref<8x128xf32, #tpu.memory_space<vmem>>, vector<8x128xf32>,
    %c0_i32_21 = arith.constant 0 : i32
    %19 = arith.cmpi eq, %arg1, %c0_i32_21 : i32
    %20 = arith.extui %19 : i1 to i32
    %c0_i32_22 = arith.constant 0 : i32
    %21 = arith.cmpi ne, %20, %c0_i32_22 : i32
    scf.if %21 {
      %c0_23 = arith.constant 0 : index
      %c0_24 = arith.constant 0 : index
      %22 = vector.load %arg6[%c0_23, %c0_24] : memref<8x128xf32, #tpu.memory_space<vmem>>, vector<8x128xf32>
      %cst = arith.constant 6.250000e-02 : f32
      %23 = vector.broadcast %cst : f32 to vector<8x128xf32>
      %24 = arith.mulf %22, %23 : vector<8x128xf32>
      %c0_25 = arith.constant 0 : index
      %c0_26 = arith.constant 0 : index
      %25 = vector.load %arg3[%c0_25, %c0_26] : memref<128x128xf32, #tpu.memory_space<vmem>>, vector<128x128xf32>
      %cst_27 = arith.constant dense<0.000000e+00> : vector<8x128xf32>
      %26 = tpu.matmul %24, %25, %cst_27 {dimension_numbers = #tpu.dot_dimension_numbers<[1], [0], [0], [1], [0, 0, 1, 1], [], []>} : vector<8x128xf32>, vector<128x128xf32>, vector<8x128xf32> -> vector<8x128xf32>
      %c0_28 = arith.constant 0 : index
      %c0_29 = arith.constant 0 : index
      %27 = vector.load %arg4[%c0_28, %c0_29] : memref<1x128xf32, #tpu.memory_space<vmem>>, vector<1x128xf32>
      %28 = vector.broadcast %27 : vector<1x128xf32> to vector<8x128xf32>
      %29 = arith.addf %26, %28 : vector<8x128xf32>
      %cst_30 = arith.constant 0.000000e+00 : f32
      %30 = vector.broadcast %cst_30 : f32 to vector<8x128xf32>
      %31 = arith.maximumf %29, %30 : vector<8x128xf32>
      %c0_31 = arith.constant 0 : index
      %c0_32 = arith.constant 0 : index
      %32 = vector.load %arg5[%c0_31, %c0_32] : memref<8x128xf32, #tpu.memory_space<vmem>>, vector<8x128xf32>
      tpu.vector_store %arg5[%c0_31, %c0_32], %31 {strides = array<i32>} : memref<8x128xf32, #tpu.memory_space<vmem>>, vector<8x128xf32>,
    } else {
    }
    return
  }
  func.func @transform_0(%arg0: i32, %arg1: i32) -> (i32, i32) {
    %c0_i32 = arith.constant 0 : i32
    return %arg0, %arg1 : i32, i32
  }
  func.func @transform_1(%arg0: i32, %arg1: i32) -> (i32, i32) {
    %c0_i32 = arith.constant 0 : i32
    %c0_i32_0 = arith.constant 0 : i32
    %c0_i32_1 = arith.constant 0 : i32
    return %c0_i32, %c0_i32_0 : i32, i32
  }
  func.func @transform_2(%arg0: i32, %arg1: i32) -> (i32, i32) {
    %c0_i32 = arith.constant 0 : i32
    %c0_i32_0 = arith.constant 0 : i32
    %c0_i32_1 = arith.constant 0 : i32
    return %c0_i32, %c0_i32_0 : i32, i32
  }
  func.func @transform_3(%arg0: i32, %arg1: i32) -> (i32, i32) {
    %c0_i32 = arith.constant 0 : i32
    %c0_i32_0 = arith.constant 0 : i32
    return %arg0, %c0_i32 : i32, i32
  }
}

</mosaic_0001>

<bundles_post_ra>
// kernel: tpu_custom_call.1
= control target key start
LH: loop header
LB: loop body
LE: loop exit
PB: predicated region body
PF: predicated region fallthrough
CT: control target
= control target key end

     0   :  { %8 = vsyncpa [#allocation4], 0  ;;  %s252_s0 = inlined_call_operand.hbm [shape: f32[8,512], index: 0, kind: input, shape index: {}]   ;;  %s253_s1 = inlined_call_operand.hbm [shape: f32[128,128], index: 1, kind: input, shape index: {}]   ;;  %s254_s2 = inlined_call_operand.vmem [shape: f32[1,128], index: 2, kind: input, shape index: {}]   ;;  %s255_s3 = inlined_call_operand.hbm [shape: f32[8,128], index: 3, kind: output, shape index: {}]  }
   0x1   :  { %9 = vsyncpa [#allocation7], 0 }
   0x2   :  { %10 = vsyncpa [#allocation5], 0  ;;  %s16_s14 = sshll.u32 %s252_s0, 4  ;;  %s215_s15 = smov [#allocation3]   ;;  %s17_s14 = int_to_ptr.hbm [resolvable:$true] %s16_s14 }
   0x3   :  { %s18_s16 = sshll.u32 %s215_s15, 4  ;;  %s26_s19 = sshll.u32 %s253_s1, 4  ;;  %s19_s16 = int_to_ptr.vmem [resolvable:$true] %s18_s16  ;;  %s27_s19 = int_to_ptr.hbm [resolvable:$true] %s26_s19 }
   0x4   :  { %21 = dma.hbm_to_vmem [thread:$0]  %s17_s14, 512, %s19_s16, [#allocation4]  }
   0x5   :  { %s216_s20 = smov [#allocation6]   ;;  %s217_s22 = smov 128  }
   0x6   :  { %s28_s21 = sshll.u32 %s216_s20, 4  ;;  %s218_s23 = smov 8   ;;  %s29_s21 = int_to_ptr.vmem [resolvable:$true] %s28_s21 }
   0x7   :  { %34 = dma.hbm_to_vmem [thread:$0]  %s27_s19, 2048, %s29_s21, [#allocation7], %s217_s22, %s217_s22, %s218_s23  }
   0x8   :  { %209 = dma.done.wait [#allocation4], 512  }
   0x9   :  { %210 = vsyncadd [#allocation4], 4294966784 }
   0xa   :  { %211 = dma.done.wait [#allocation7], 2048  }
   0xb   :  { %212 = vsyncadd [#allocation7], 4294965248  ;;  %v86_v0 = vld [vmem:[#allocation6 + $0x78] sm:$0xff]  ;;  %v85_v1 = vld [vmem:[#allocation6 + $0x70] sm:$0xff]  ;;  %s219_s24 = smov [#allocation8]   ;;  %s120_s28 = sshll.u32 %s255_s3, 4  ;;  %s121_s28 = int_to_ptr.hbm [resolvable:$true] %s120_s28 }
   0xc   :  { %91 = vmatpush.msra.mxu0 %v86_v0  ;;  %v84_v2 = vld [vmem:[#allocation6 + $0x68] sm:$0xff]  ;;  %v83_v3 = vld [vmem:[#allocation6 + $0x60] sm:$0xff]  ;;  %v82_v4 = vld [vmem:[#allocation6 + $0x58] sm:$0xff]  ;;  %s118_s25 = sshll.u32 %s219_s24, 4  ;;  %s119_s25 = int_to_ptr.vmem [resolvable:$true] %s118_s25 }
   0xd   :  { %v81_v5 = vld [vmem:[#allocation6 + $0x50] sm:$0xff]  ;;  %v80_v6 = vld [vmem:[#allocation6 + $0x48] sm:$0xff]  ;;  %v79_v7 = vld [vmem:[#allocation6 + $0x40] sm:$0xff] }
   0xe   :  { %92 = vmatpush.msra.mxu0 %v85_v1  ;;  %v51_v8 = vld [vmem:[#allocation3] sm:$0xff]  ;;  %v55_v9 = vld [vmem:[#allocation3 + $0x8] sm:$0xff]  ;;  %v78_v10 = vld [vmem:[#allocation6 + $0x38] sm:$0xff] }
   0xf   :  { %v77_v11 = vld [vmem:[#allocation6 + $0x30] sm:$0xff]  ;;  %v56_v12 = vadd.f32 %v55_v9, %v51_v8  ;;  %v76_v14 = vld [vmem:[#allocation6 + $0x28] sm:$0xff]  ;;  %v75_v15 = vld [vmem:[#allocation6 + $0x20] sm:$0xff] }
  0x10   :  { %93 = vmatpush.msra.mxu0 %v84_v2  ;;  %v59_v13 = vld [vmem:[#allocation3 + $0x10] sm:$0xff]  ;;  %v63_v17 = vld [vmem:[#allocation3 + $0x18] sm:$0xff]  ;;  %v72_v21 = vld [vmem:[#allocation6 + $0x8] sm:$0xff] }
  0x11   :  { %v60_v16 = vadd.f32 %v59_v13, %v56_v12  ;;  %v74_v18 = vld [vmem:[#allocation6 + $0x18] sm:$0xff]  ;;  %v73_v19 = vld [vmem:[#allocation6 + $0x10] sm:$0xff]  ;;  %v71_v22 = vld [vmem:[#allocation6] sm:$0xff] }
  0x12   :  { %94 = vmatpush.msra.mxu0 %v83_v3  ;;  %v136_v24 = vld [vmem:[%s254_s2] ss:$0 sm:$0xff] }
  0x13   :  { %v64_v20 = vadd.f32 %v63_v17, %v60_v16 }
  0x14   :  { %95 = vmatpush.msra.mxu0 %v82_v4 }
  0x15   :  { %v70_v23 = vmul.f32 0.0625, %v64_v20 }
  0x16   :  { %96 = vmatpush.msra.mxu0 %v81_v5 }
  0x18   :  { %97 = vmatpush.msra.mxu0 %v80_v6 }
  0x1a   :  { %98 = vmatpush.msra.mxu0 %v79_v7 }
  0x1c   :  { %99 = vmatpush.msra.mxu0 %v78_v10 }
  0x1e   :  { %100 = vmatpush.msra.mxu0 %v77_v11 }
  0x20   :  { %101 = vmatpush.msra.mxu0 %v76_v14 }
  0x22   :  { %102 = vmatpush.msra.mxu0 %v75_v15 }
  0x24   :  { %103 = vmatpush.msra.mxu0 %v74_v18 }
  0x26   :  { %104 = vmatpush.msra.mxu0 %v73_v19 }
  0x28   :  { %105 = vmatpush.msra.mxu0 %v72_v21 }
  0x2a   :  { %106 = vmatpush.msra.mxu0 %v71_v22 }
  0x2b   :  { %107 = vmatmul.f32.vlgmr.msra.gmra.mxu0 %v70_v23 }
  0xa8   :  { %v108_v25 = vpop.f32.mrf.mxu0 }
  0xa9   :  { %v109_v26 = vadd.f32 %v136_v24, %v108_v25 }
  0xab   :  { %v111_v27 = vmax.f32 %v109_v26, 0.0 }
  0xad   :  { %112 = vst [vmem:[#allocation8] sm:$0xff] %v111_v27 }
  0xae   :  { %123 = dma.vmem_to_hbm [thread:$0]  %s119_s25, 128, %s121_s28, [#allocation5]  }
  0xaf   :  { %213 = dma.done.wait [#allocation5], 128  }
  0xb0   :  { %214 = vsyncadd [#allocation5], 4294967168 }
  0xb1   :  { %128 = vsyncpa [#allocation4], 1 }
  0xb2   :  { %129 = vsyncpa [#allocation7], 1 }
  0xb3   :  { %130 = vsyncpa [#allocation5], 1 }

</bundles_post_ra>
